<compile_context>
chip_gen: v6e
topology: v6e:2x2x1
jax: 0.10.0
libtpu: 0.0.40
codegen_flags: <defaults>
</compile_context>

<pallas_src>
import jax
import jax.numpy as jnp
from jax.experimental import pallas as pl
from jax.experimental.pallas import tpu as pltpu


HIDDEN = 64       # fc1 output width, fixed by the module
LANE = 128        # TPU lane width
SUBLANE = 8       # TPU sublane width

VMEM_WORKSET_BYTES = 28 * 1024 * 1024   # target working set (safe on v7x's 64 MiB VMEM)
VMEM_LIMIT_BYTES = 48 * 1024 * 1024     # explicit scoped-VMEM limit (headroom over target)


def _round_up(x, m):
    return ((x + m - 1) // m) * m


def _choose_batch_tile(batch, d):
    """Pick the batch tile TB from a per-generation-safe VMEM budget."""
    d_pad = _round_up(max(d, 1), LANE)
    # VMEM-resident, double-buffered, lane-padded (D, 64) W1 block.
    w1_bytes = 2 * _round_up(max(d, 1), SUBLANE) * LANE * 4
    budget = max(VMEM_WORKSET_BYTES - w1_bytes, 2 * 1024 * 1024)
    # f32 VMEM bytes per batch row:
    #   x (2 buffers, minor dim padded to d_pad)
    # + ~3 (TB, 64->128) temporaries (fc1 result, tanh, h*w2)
    # + out (2 buffers, minor dim 1 padded to 128 lanes)
    per_row = 4 * (2 * d_pad + 5 * LANE)
    cap = budget // per_row
    if cap >= 256:
        cap = (cap // 256) * 256
    else:
        cap = max(SUBLANE, (cap // SUBLANE) * SUBLANE)

    if batch > cap:
        return int(cap)
    if batch > 1024:
        # Whole batch fits one tile; still split so the "parallel" grid axis
        # gives both v7x TensorCores work (moot on single-TC v5e/v6e).
        return int(min(cap, _round_up(-(-batch // 2), 256)))
    # Small batch: one exact tile (block dims equal to array dims are legal).
    return int(max(batch, 1))


def _value_kernel(x_ref, w1t_ref, b1_ref, w2_ref, b2_ref, o_ref):
    x = x_ref[...]                                        # (TB, D)  f32, natural layout
    # fc1 on the MXU: (TB, D) @ (D, 64), f32 accumulation, then EUP tanh.
    h = jnp.tanh(
        jnp.dot(x, w1t_ref[...], preferred_element_type=jnp.float32) + b1_ref[...]
    )                                                     # (TB, 64)
    # fc2 off the MXU: VPU multiply + XLU lane-sum (free filler next to EUP/DMA).
    v = jnp.sum(h * w2_ref[...], axis=-1, keepdims=True) + b2_ref[...]   # (TB, 1)
    o_ref[...] = v.astype(o_ref.dtype)


@jax.jit
def value_forward(x, w1, b1, w2, b2):
    """Critic forward.

    x:  (..., D) observations
    w1: (64, D)  fc1 weight (PyTorch (out, in) layout)
    b1: (64,)    fc1 bias
    w2: (1, 64)  fc2 weight
    b2: (1,)     fc2 bias
    returns (B, 1) with B = prod(leading dims of x)
    """
    d = w1.shape[1]
    # preprocess_obs_fn: flatten to (-1, D), float32.  No transpose / pad of the
    # dominant batch stream (both were extra full HBM passes before).
    x2 = jnp.asarray(x, jnp.float32).reshape(-1, d)
    batch = x2.shape[0]

    tb = _choose_batch_tile(batch, d)
    grid = (pl.cdiv(batch, tb),)

    # Tiny parameter reshapes only (~64*D elements) — negligible HBM traffic.
    w1t = jnp.asarray(w1, jnp.float32).T                 # (D, 64), so kernel does x @ W1^T
    b1r = jnp.asarray(b1, jnp.float32).reshape(1, HIDDEN)
    w2r = jnp.asarray(w2, jnp.float32).reshape(1, HIDDEN)
    b2r = jnp.asarray(b2, jnp.float32).reshape(1, 1)

    out = pl.pallas_call(
        _value_kernel,
        out_shape=jax.ShapeDtypeStruct((batch, 1), jnp.float32),
        grid=grid,
        in_specs=[
            pl.BlockSpec((tb, d), lambda i: (i, 0)),       # x: streamed batch tiles (ragged last)
            pl.BlockSpec((d, HIDDEN), lambda i: (0, 0)),   # W1^T: VMEM-resident
            pl.BlockSpec((1, HIDDEN), lambda i: (0, 0)),   # b1
            pl.BlockSpec((1, HIDDEN), lambda i: (0, 0)),   # W2 row
            pl.BlockSpec((1, 1), lambda i: (0, 0)),        # b2
        ],
        out_specs=pl.BlockSpec((tb, 1), lambda i: (i, 0)),  # OOB tail rows masked on store
        compiler_params=pltpu.CompilerParams(
            dimension_semantics=("parallel",),
            vmem_limit_bytes=VMEM_LIMIT_BYTES,
        ),
    )(x2, w1t, b1r, w2r, b2r)

    return out  # already the module's (B, 1) shape


def orthogonal_init(key, shape):
    """Deterministic orthogonal init (like torch.nn.init.orthogonal_)."""
    rows, cols = shape
    n = max(rows, cols)
    a = jax.random.normal(key, (n, n), dtype=jnp.float32)
    q, r = jnp.linalg.qr(a)
    sign = jnp.sign(jnp.diag(r))
    sign = jnp.where(sign == 0, 1.0, sign)  # avoid zeroing a column
    q = q * sign
    return q[:rows, :cols]


if __name__ == "__main__":
    key = jax.random.PRNGKey(0)
    k_x, k_x2, k_w1, k_w2, k_b1, k_b2 = jax.random.split(key, 6)

    input_shape = 8   # observation dim (small Box obs space)
    batch = 4

    # PyTorch Linear weights are (out, in).
    w1 = orthogonal_init(k_w1, (HIDDEN, input_shape))   # (64, D)
    w2 = orthogonal_init(k_w2, (1, HIDDEN))             # (1, 64)
    b1 = 0.1 * jax.random.normal(k_b1, (HIDDEN,), dtype=jnp.float32)
    b2 = 0.1 * jax.random.normal(k_b2, (1,), dtype=jnp.float32)

    def reference(xx):
        return jnp.tanh(xx @ w1.T + b1[None, :]) @ w2.T + b2[None, :]

    # Small-batch check (single exact tile).
    x = jax.random.normal(k_x, (batch, input_shape), dtype=jnp.float32)
    out = jax.block_until_ready(value_forward(x, w1, b1, w2, b2))
    assert out.shape == (batch, 1)
    assert jnp.allclose(out, reference(x), atol=2e-5, rtol=2e-5)

    # Larger-batch check: >=2 grid steps + ragged (masked) last tile.
    batch2 = 2000
    xl = jax.random.normal(k_x2, (batch2, input_shape), dtype=jnp.float32)
    out2 = jax.block_until_ready(value_forward(xl, w1, b1, w2, b2))
    assert out2.shape == (batch2, 1)
    assert jnp.allclose(out2, reference(xl), atol=2e-5, rtol=2e-5)

    print("KERNEL_OK")
</pallas_src>

<mosaic_0001>
module attributes {stable_mosaic.version = 11 : i64} {
  func.func @_value_kernel(%arg0: i32, %arg1: memref<4x8xf32, #tpu.memory_space<vmem>>, %arg2: memref<8x64xf32, #tpu.memory_space<vmem>>, %arg3: memref<1x64xf32, #tpu.memory_space<vmem>>, %arg4: memref<1x64xf32, #tpu.memory_space<vmem>>, %arg5: memref<1x1xf32, #tpu.memory_space<vmem>>, %arg6: memref<4x1xf32, #tpu.memory_space<vmem>>) attributes {dimension_semantics = [#tpu.dimension_semantics<parallel>], iteration_bounds = array<i64: 1>, scalar_prefetch = 0 : i64, scratch_operands = 0 : i64, tpu.core_type = #tpu.core_type<tc>, window_params = [{transform_indices = @transform_0, window_bounds = array<i64: 4, 8>}, {pipeline_mode = #tpu.pipeline_mode<synchronous>, transform_indices = @transform_1, window_bounds = array<i64: 8, 64>}, {pipeline_mode = #tpu.pipeline_mode<synchronous>, transform_indices = @transform_2, window_bounds = array<i64: 1, 64>}, {pipeline_mode = #tpu.pipeline_mode<synchronous>, transform_indices = @transform_3, window_bounds = array<i64: 1, 64>}, {pipeline_mode = #tpu.pipeline_mode<synchronous>, transform_indices = @transform_4, window_bounds = array<i64: 1, 1>}, {transform_indices = @transform_5, window_bounds = array<i64: 4, 1>}]} {
    %c0 = arith.constant 0 : index
    %c0_0 = arith.constant 0 : index
    %0 = vector.load %arg1[%c0, %c0_0] : memref<4x8xf32, #tpu.memory_space<vmem>>, vector<4x8xf32>
    %c0_1 = arith.constant 0 : index
    %c0_2 = arith.constant 0 : index
    %1 = vector.load %arg2[%c0_1, %c0_2] : memref<8x64xf32, #tpu.memory_space<vmem>>, vector<8x64xf32>
    %cst = arith.constant dense<0.000000e+00> : vector<4x64xf32>
    %2 = tpu.matmul %0, %1, %cst {dimension_numbers = #tpu.dot_dimension_numbers<[1], [0], [0], [1], [0, 0, 1, 1], [], []>} : vector<4x8xf32>, vector<8x64xf32>, vector<4x64xf32> -> vector<4x64xf32>
    %c0_3 = arith.constant 0 : index
    %c0_4 = arith.constant 0 : index
    %3 = vector.load %arg3[%c0_3, %c0_4] : memref<1x64xf32, #tpu.memory_space<vmem>>, vector<1x64xf32>
    %4 = vector.broadcast %3 : vector<1x64xf32> to vector<4x64xf32>
    %5 = arith.addf %2, %4 : vector<4x64xf32>
    %6 = math.tanh %5 : vector<4x64xf32>
    %c0_5 = arith.constant 0 : index
    %c0_6 = arith.constant 0 : index
    %7 = vector.load %arg4[%c0_5, %c0_6] : memref<1x64xf32, #tpu.memory_space<vmem>>, vector<1x64xf32>
    %8 = vector.broadcast %7 : vector<1x64xf32> to vector<4x64xf32>
    %9 = arith.mulf %6, %8 : vector<4x64xf32>
    %cst_7 = arith.constant dense<0.000000e+00> : vector<4xf32>
    %10 = vector.multi_reduction <add>, %9, %cst_7 [1] : vector<4x64xf32> to vector<4xf32>
    %11 = vector.shape_cast %10 : vector<4xf32> to vector<4x1xf32>
    %c0_8 = arith.constant 0 : index
    %c0_9 = arith.constant 0 : index
    %12 = vector.load %arg5[%c0_8, %c0_9] : memref<1x1xf32, #tpu.memory_space<vmem>>, vector<1x1xf32>
    %13 = vector.broadcast %12 : vector<1x1xf32> to vector<4x1xf32>
    %14 = arith.addf %11, %13 : vector<4x1xf32>
    %c0_10 = arith.constant 0 : index
    %c0_11 = arith.constant 0 : index
    %15 = vector.load %arg6[%c0_10, %c0_11] : memref<4x1xf32, #tpu.memory_space<vmem>>, vector<4x1xf32>
    tpu.vector_store %arg6[%c0_10, %c0_11], %14 {strides = array<i32>} : memref<4x1xf32, #tpu.memory_space<vmem>>, vector<4x1xf32>,
    return
  }
  func.func @transform_0(%arg0: i32) -> (i32, i32) {
    %c0_i32 = arith.constant 0 : i32
    %c0_i32_0 = arith.constant 0 : i32
    return %arg0, %c0_i32 : i32, i32
  }
  func.func @transform_1(%arg0: i32) -> (i32, i32) {
    %c0_i32 = arith.constant 0 : i32
    %c0_i32_0 = arith.constant 0 : i32
    %c0_i32_1 = arith.constant 0 : i32
    return %c0_i32, %c0_i32_0 : i32, i32
  }
  func.func @transform_2(%arg0: i32) -> (i32, i32) {
    %c0_i32 = arith.constant 0 : i32
    %c0_i32_0 = arith.constant 0 : i32
    %c0_i32_1 = arith.constant 0 : i32
    return %c0_i32, %c0_i32_0 : i32, i32
  }
  func.func @transform_3(%arg0: i32) -> (i32, i32) {
    %c0_i32 = arith.constant 0 : i32
    %c0_i32_0 = arith.constant 0 : i32
    %c0_i32_1 = arith.constant 0 : i32
    return %c0_i32, %c0_i32_0 : i32, i32
  }
  func.func @transform_4(%arg0: i32) -> (i32, i32) {
    %c0_i32 = arith.constant 0 : i32
    %c0_i32_0 = arith.constant 0 : i32
    %c0_i32_1 = arith.constant 0 : i32
    return %c0_i32, %c0_i32_0 : i32, i32
  }
  func.func @transform_5(%arg0: i32) -> (i32, i32) {
    %c0_i32 = arith.constant 0 : i32
    %c0_i32_0 = arith.constant 0 : i32
    return %arg0, %c0_i32 : i32, i32
  }
}

</mosaic_0001>

<bundles_post_ra>
// kernel: value_forward.1
= control target key start
LH: loop header
LB: loop body
LE: loop exit
PB: predicated region body
PF: predicated region fallthrough
CT: control target
= control target key end

     0   :  { %s234_s0 = inlined_call_operand.hbm [shape: f32[4,8], index: 0, kind: input, shape index: {}]   ;;  %s235_s1 = inlined_call_operand.vmem [shape: f32[8,64], index: 1, kind: input, shape index: {}]   ;;  %s236_s2 = inlined_call_operand.vmem [shape: f32[1,64], index: 2, kind: input, shape index: {}]   ;;  %s237_s3 = inlined_call_operand.vmem [shape: f32[1,64], index: 3, kind: input, shape index: {}]   ;;  %s238_s4 = inlined_call_operand.<no memory space> [shape: f32[1,1], index: 4, kind: input, shape index: {}]   ;;  %s239_s5 = inlined_call_operand.vmem [shape: f32[4,1], index: 5, kind: output, shape index: {}]  }
   0x1   :  { %v10_v0 = vstv %s238_s4 }
   0x2   :  { %11 = vst [vmem:[#allocation2] sm:$0x1] %v10_v0 }
   0x3   :  { %12 = vsyncpa [#allocation4], 0  ;;  %s183_s20 = smov [#allocation3]  }
   0x4   :  { %s19_s21 = sshll.u32 %s183_s20, 4  ;;  %s20_s21 = int_to_ptr.vmem [resolvable:$true] %s19_s21 }
   0x5   :  { %s169_s22 = scalar_lea.vmem %s20_s21, 64  ;;  %p174_p1 = scmp.lt.s32.totalorder %s20_s21, %s20_s21 }
   0x6   :  { %p170_p0 = scmp.ne.s32.totalorder %s20_s21, %s169_s22  ;;  %p175_p2 = scmp.lt.s32.totalorder %s169_s22, %s169_s22 }
   0x8   :  { %p176_p3 = por %p175_p2, %p174_p1 }
   0xa   :  { %p177_p4 = pnand %p176_p3, %p170_p0 }
   0xc   :  { %180 = shalt.err (!%p177_p4)
}
   0xd   :  { %22 = dma.hbm_to_vmem [thread:$0]  %s234_s0, 64, %s20_s21, [#allocation4]  }
   0xe   :  { %181 = dma.done.wait [#allocation4], 64  }
   0xf   :  { %182 = vsyncadd [#allocation4], 4294967232  ;;  %v184_v1 = vmov 0.0   ;;  %vm185_vm0 = vmmov 0   ;;  %vm43_vm1 = vcmask 64512   ;;  %v35_v2 = vld [vmem:[%s235_s1] sm:$0xff] }
  0x10   :  { %151 = vmatprep.subr.mxu0 %v184_v1  ;;  %153 = vmatprep.mubr.msk.f32.mxu0 %vm185_vm0, %v184_v1  ;;  %v34_v3 = vld [vmem:[#allocation3] sm:$0xf]  ;;  %v145_v4 = vld [vmem:[%s236_s2] ss:$0 sm:$0xff]  ;;  %vm126_vm2 = vcmask 519168   ;;  %vm138_vm3 = vcmask 3072  }
  0x11   :  { %152 = vmatpush3.msra.mxu0 %v35_v2  ;;  %v147_v8 = vld [vmem:[%s237_s3] ss:$0 sm:$0xff] }
  0x12   :  { %154 = vmatmul.mubr.msk.f32.vlgmr.msra.gmra.mxu0 %vm43_vm1, %v34_v3  ;;  %v148_v12 = vld [vmem:[#allocation2] ss:$0 sm:$0xff] }
  0xd2   :  { %v113_v5 = vpop.f32.mrf.mxu0 }
  0xd3   :  { %v114_v6 = vadd.f32 %v145_v4, %v113_v5 }
  0xd4   :  { %v155_v7 = vpop.f32.mrf.mxu0 }
  0xd5   :  { %159 = vtanh.f32 %v114_v6 }
  0xe2   :  { %v160_v9 = vpop.eup %159 }
  0xe3   :  { %v125_v10 = vmul.f32 %v160_v9, %v147_v8 }
  0xe5   :  { %v127_v11 = vsel %vm126_vm2, %v125_v10, 0.0 }
  0xe6   :  { %128 = vadd.xlane.f32.xlu0 %v127_v11 }
 0x16f   :  { %v129_v13 = vpop.xlane.xlu0 %128 }
 0x170   :  { %v137_v14 = vadd.f32 %v148_v12, %v129_v13 }
 0x172   :  { %139 = vst.msk [vmem:[%s239_s5] sm:$0xf] %vm138_vm3, %v137_v14 }
 0x173   :  { %144 = vsyncpa [#allocation4], 1 }

</bundles_post_ra>
